<compile_context>
chip_gen: v5e
topology: v5e:2x2
jax: 0.10.0
libtpu: 0.0.40
codegen_flags: <defaults>
</compile_context>

<pallas_src>
import jax
import jax.numpy as jnp
from jax.experimental import pallas as pl
from jax.experimental.pallas import tpu as pltpu


def base_learner_kernel(x_ref, wf_ref, b1_ref, w2_ref, b2_ref, w3_ref, b3_ref, out_ref):
    # fused (embeddings + fc1) + relu   -- one MXU pass
    f1 = jnp.dot(x_ref[...], wf_ref[...], preferred_element_type=jnp.float32) + b1_ref[...]
    f1 = jnp.maximum(f1, 0.0)

    # fc2 + relu                        -- one MXU pass
    f2 = jnp.dot(f1, w2_ref[...], preferred_element_type=jnp.float32) + b2_ref[...]
    f2 = jnp.maximum(f2, 0.0)

    # linear_out -> [TM, 1] via VPU mul + lane reduce (no single-column MXU pass)
    out_ref[...] = jnp.sum(f2 * w3_ref[...], axis=-1, keepdims=True) + b3_ref[...]


def base_learner_forward(x, params, item_dim, tm=512):
    x = x.astype(jnp.float32)
    N, F = x.shape

    wi, wu = params["wi"], params["wu"]
    emb_half = wi.shape[1]

    # Exact algebraic fusion: W_fused = blockdiag(wi, wu) @ w1
    w_blockdiag = jnp.zeros((F, 2 * emb_half), jnp.float32)
    w_blockdiag = w_blockdiag.at[:item_dim, :emb_half].set(wi)
    w_blockdiag = w_blockdiag.at[item_dim:, emb_half:].set(wu)
    w_fused = w_blockdiag @ params["w1"]          # [F, fc2_in_dim]

    w3_row = params["w3"].T                       # [1, fc2_out_dim]

    b1, b2, b3 = params["b1"], params["b2"], params["b3"]
    h1 = w_fused.shape[1]
    h2 = params["w2"].shape[1]

    # Batch tiling: single full block for tiny N, otherwise TM-row tiles (TM % 8 == 0).
    if N <= tm:
        tm_eff, n_pad = N, N
    else:
        tm_eff = tm
        n_pad = pl.cdiv(N, tm_eff) * tm_eff
        if n_pad != N:
            x = jnp.pad(x, ((0, n_pad - N), (0, 0)))
    grid = (n_pad // tm_eff,)

    resident = lambda shape: pl.BlockSpec(shape, lambda i: (0, 0))  # weights stay in VMEM

    out = pl.pallas_call(
        base_learner_kernel,
        out_shape=jax.ShapeDtypeStruct((n_pad, 1), jnp.float32),
        grid=grid,
        in_specs=[
            pl.BlockSpec((tm_eff, F), lambda i: (i, 0)),   # x tile
            resident((F, h1)),                              # fused weight
            resident((1, h1)),                              # b1
            resident((h1, h2)),                             # w2
            resident((1, h2)),                              # b2
            resident((1, h2)),                              # w3 as a row
            resident((1, 1)),                               # b3
        ],
        out_specs=pl.BlockSpec((tm_eff, 1), lambda i: (i, 0)),
        compiler_params=pltpu.CompilerParams(
            dimension_semantics=("parallel",),
            vmem_limit_bytes=32 * 1024 * 1024,
        ),
    )(x, w_fused, b1, params["w2"], b2, w3_row, b3)

    return out[:N]


def reference_forward(x, params, item_dim):
    x = x.astype(jnp.float32)
    item_x, user_x = x[:, :item_dim], x[:, item_dim:]
    item_emb = item_x @ params["wi"]
    user_emb = user_x @ params["wu"]
    h = jnp.concatenate([item_emb, user_emb], axis=1)
    f1 = jnp.maximum(h @ params["w1"] + params["b1"], 0.0)
    f2 = jnp.maximum(f1 @ params["w2"] + params["b2"], 0.0)
    return f2 @ params["w3"] + params["b3"]


if __name__ == "__main__":
    # args (small, consistent with the module):
    embedding_dim = 8
    first_fc_hidden_dim = 32
    second_fc_hidden_dim = 16
    item_dim = 12                           # args.item
    user_dim = 10
    N = 20                                  # support-set size ("20 items per user")

    fc1_in_dim = embedding_dim * 8          # 64
    fc2_in_dim = first_fc_hidden_dim        # 32
    fc2_out_dim = second_fc_hidden_dim * 2  # 32
    emb_half = embedding_dim * 4            # 32 (item_emb dim == user_emb dim)

    key = jax.random.PRNGKey(0)
    ks = jax.random.split(key, 10)

    params = {
        "wi": jax.random.normal(ks[0], (item_dim, emb_half), jnp.float32) * 0.1,
        "wu": jax.random.normal(ks[1], (user_dim, emb_half), jnp.float32) * 0.1,
        "w1": jax.random.normal(ks[2], (fc1_in_dim, fc2_in_dim), jnp.float32) * 0.1,
        "b1": jax.random.normal(ks[3], (1, fc2_in_dim), jnp.float32) * 0.1,
        "w2": jax.random.normal(ks[4], (fc2_in_dim, fc2_out_dim), jnp.float32) * 0.1,
        "b2": jax.random.normal(ks[5], (1, fc2_out_dim), jnp.float32) * 0.1,
        "w3": jax.random.normal(ks[6], (fc2_out_dim, 1), jnp.float32) * 0.1,
        "b3": jax.random.normal(ks[7], (1, 1), jnp.float32) * 0.1,
    }

    x = jax.random.normal(ks[8], (N, item_dim + user_dim), jnp.float32)

    out = base_learner_forward(x, params, item_dim)
    out = jax.block_until_ready(out)

    ref = reference_forward(x, params, item_dim)
    assert out.shape == (N, 1)
    assert jnp.allclose(out, ref, atol=1e-4, rtol=1e-4)

    # Also exercise the tiled (gridded) path with a larger batch.
    x_big = jax.random.normal(ks[9], (1100, item_dim + user_dim), jnp.float32)
    out_big = jax.block_until_ready(base_learner_forward(x_big, params, item_dim))
    ref_big = reference_forward(x_big, params, item_dim)
    assert out_big.shape == (1100, 1)
    assert jnp.allclose(out_big, ref_big, atol=1e-4, rtol=1e-4)

    print("KERNEL_OK")
</pallas_src>

<mosaic_0001>
module attributes {stable_mosaic.version = 11 : i64} {
  func.func @base_learner_kernel(%arg0: i32, %arg1: memref<20x22xf32, #tpu.memory_space<vmem>>, %arg2: memref<22x32xf32, #tpu.memory_space<vmem>>, %arg3: memref<1x32xf32, #tpu.memory_space<vmem>>, %arg4: memref<32x32xf32, #tpu.memory_space<vmem>>, %arg5: memref<1x32xf32, #tpu.memory_space<vmem>>, %arg6: memref<1x32xf32, #tpu.memory_space<vmem>>, %arg7: memref<1x1xf32, #tpu.memory_space<vmem>>, %arg8: memref<20x1xf32, #tpu.memory_space<vmem>>) attributes {dimension_semantics = [#tpu.dimension_semantics<parallel>], iteration_bounds = array<i64: 1>, scalar_prefetch = 0 : i64, scratch_operands = 0 : i64, tpu.core_type = #tpu.core_type<tc>, window_params = [{transform_indices = @transform_0, window_bounds = array<i64: 20, 22>}, {pipeline_mode = #tpu.pipeline_mode<synchronous>, transform_indices = @transform_1, window_bounds = array<i64: 22, 32>}, {pipeline_mode = #tpu.pipeline_mode<synchronous>, transform_indices = @transform_2, window_bounds = array<i64: 1, 32>}, {pipeline_mode = #tpu.pipeline_mode<synchronous>, transform_indices = @transform_3, window_bounds = array<i64: 32, 32>}, {pipeline_mode = #tpu.pipeline_mode<synchronous>, transform_indices = @transform_4, window_bounds = array<i64: 1, 32>}, {pipeline_mode = #tpu.pipeline_mode<synchronous>, transform_indices = @transform_5, window_bounds = array<i64: 1, 32>}, {pipeline_mode = #tpu.pipeline_mode<synchronous>, transform_indices = @transform_6, window_bounds = array<i64: 1, 1>}, {transform_indices = @transform_7, window_bounds = array<i64: 20, 1>}]} {
    %c0 = arith.constant 0 : index
    %c0_0 = arith.constant 0 : index
    %0 = vector.load %arg1[%c0, %c0_0] : memref<20x22xf32, #tpu.memory_space<vmem>>, vector<20x22xf32>
    %c0_1 = arith.constant 0 : index
    %c0_2 = arith.constant 0 : index
    %1 = vector.load %arg2[%c0_1, %c0_2] : memref<22x32xf32, #tpu.memory_space<vmem>>, vector<22x32xf32>
    %cst = arith.constant dense<0.000000e+00> : vector<20x32xf32>
    %2 = tpu.matmul %0, %1, %cst {dimension_numbers = #tpu.dot_dimension_numbers<[1], [0], [0], [1], [0, 0, 1, 1], [], []>} : vector<20x22xf32>, vector<22x32xf32>, vector<20x32xf32> -> vector<20x32xf32>
    %c0_3 = arith.constant 0 : index
    %c0_4 = arith.constant 0 : index
    %3 = vector.load %arg3[%c0_3, %c0_4] : memref<1x32xf32, #tpu.memory_space<vmem>>, vector<1x32xf32>
    %4 = vector.broadcast %3 : vector<1x32xf32> to vector<20x32xf32>
    %5 = arith.addf %2, %4 : vector<20x32xf32>
    %cst_5 = arith.constant 0.000000e+00 : f32
    %6 = vector.broadcast %cst_5 : f32 to vector<20x32xf32>
    %7 = arith.maximumf %5, %6 : vector<20x32xf32>
    %c0_6 = arith.constant 0 : index
    %c0_7 = arith.constant 0 : index
    %8 = vector.load %arg4[%c0_6, %c0_7] : memref<32x32xf32, #tpu.memory_space<vmem>>, vector<32x32xf32>
    %cst_8 = arith.constant dense<0.000000e+00> : vector<20x32xf32>
    %9 = tpu.matmul %7, %8, %cst_8 {dimension_numbers = #tpu.dot_dimension_numbers<[1], [0], [0], [1], [0, 0, 1, 1], [], []>} : vector<20x32xf32>, vector<32x32xf32>, vector<20x32xf32> -> vector<20x32xf32>
    %c0_9 = arith.constant 0 : index
    %c0_10 = arith.constant 0 : index
    %10 = vector.load %arg5[%c0_9, %c0_10] : memref<1x32xf32, #tpu.memory_space<vmem>>, vector<1x32xf32>
    %11 = vector.broadcast %10 : vector<1x32xf32> to vector<20x32xf32>
    %12 = arith.addf %9, %11 : vector<20x32xf32>
    %cst_11 = arith.constant 0.000000e+00 : f32
    %13 = vector.broadcast %cst_11 : f32 to vector<20x32xf32>
    %14 = arith.maximumf %12, %13 : vector<20x32xf32>
    %c0_12 = arith.constant 0 : index
    %c0_13 = arith.constant 0 : index
    %15 = vector.load %arg6[%c0_12, %c0_13] : memref<1x32xf32, #tpu.memory_space<vmem>>, vector<1x32xf32>
    %16 = vector.broadcast %15 : vector<1x32xf32> to vector<20x32xf32>
    %17 = arith.mulf %14, %16 : vector<20x32xf32>
    %cst_14 = arith.constant dense<0.000000e+00> : vector<20xf32>
    %18 = vector.multi_reduction <add>, %17, %cst_14 [1] : vector<20x32xf32> to vector<20xf32>
    %19 = vector.shape_cast %18 : vector<20xf32> to vector<20x1xf32>
    %c0_15 = arith.constant 0 : index
    %c0_16 = arith.constant 0 : index
    %20 = vector.load %arg7[%c0_15, %c0_16] : memref<1x1xf32, #tpu.memory_space<vmem>>, vector<1x1xf32>
    %21 = vector.broadcast %20 : vector<1x1xf32> to vector<20x1xf32>
    %22 = arith.addf %19, %21 : vector<20x1xf32>
    %c0_17 = arith.constant 0 : index
    %c0_18 = arith.constant 0 : index
    %23 = vector.load %arg8[%c0_17, %c0_18] : memref<20x1xf32, #tpu.memory_space<vmem>>, vector<20x1xf32>
    tpu.vector_store %arg8[%c0_17, %c0_18], %22 {strides = array<i32>} : memref<20x1xf32, #tpu.memory_space<vmem>>, vector<20x1xf32>,
    return
  }
  func.func @transform_0(%arg0: i32) -> (i32, i32) {
    %c0_i32 = arith.constant 0 : i32
    %c0_i32_0 = arith.constant 0 : i32
    return %arg0, %c0_i32 : i32, i32
  }
  func.func @transform_1(%arg0: i32) -> (i32, i32) {
    %c0_i32 = arith.constant 0 : i32
    %c0_i32_0 = arith.constant 0 : i32
    %c0_i32_1 = arith.constant 0 : i32
    return %c0_i32, %c0_i32_0 : i32, i32
  }
  func.func @transform_2(%arg0: i32) -> (i32, i32) {
    %c0_i32 = arith.constant 0 : i32
    %c0_i32_0 = arith.constant 0 : i32
    %c0_i32_1 = arith.constant 0 : i32
    return %c0_i32, %c0_i32_0 : i32, i32
  }
  func.func @transform_3(%arg0: i32) -> (i32, i32) {
    %c0_i32 = arith.constant 0 : i32
    %c0_i32_0 = arith.constant 0 : i32
    %c0_i32_1 = arith.constant 0 : i32
    return %c0_i32, %c0_i32_0 : i32, i32
  }
  func.func @transform_4(%arg0: i32) -> (i32, i32) {
    %c0_i32 = arith.constant 0 : i32
    %c0_i32_0 = arith.constant 0 : i32
    %c0_i32_1 = arith.constant 0 : i32
    return %c0_i32, %c0_i32_0 : i32, i32
  }
  func.func @transform_5(%arg0: i32) -> (i32, i32) {
    %c0_i32 = arith.constant 0 : i32
    %c0_i32_0 = arith.constant 0 : i32
    %c0_i32_1 = arith.constant 0 : i32
    return %c0_i32, %c0_i32_0 : i32, i32
  }
  func.func @transform_6(%arg0: i32) -> (i32, i32) {
    %c0_i32 = arith.constant 0 : i32
    %c0_i32_0 = arith.constant 0 : i32
    %c0_i32_1 = arith.constant 0 : i32
    return %c0_i32, %c0_i32_0 : i32, i32
  }
  func.func @transform_7(%arg0: i32) -> (i32, i32) {
    %c0_i32 = arith.constant 0 : i32
    %c0_i32_0 = arith.constant 0 : i32
    return %arg0, %c0_i32 : i32, i32
  }
}

</mosaic_0001>

<bundles_post_ra>
// kernel: tpu_custom_call.1
= control target key start
LH: loop header
LB: loop body
LE: loop exit
PB: predicated region body
PF: predicated region fallthrough
CT: control target
= control target key end

     0   :  { %s393_s0 = inlined_call_operand.hbm [shape: f32[20,22], index: 0, kind: input, shape index: {}]   ;;  %s394_s1 = inlined_call_operand.hbm [shape: f32[22,32], index: 1, kind: input, shape index: {}]   ;;  %s395_s2 = inlined_call_operand.vmem [shape: f32[1,32], index: 2, kind: input, shape index: {}]   ;;  %s396_s3 = inlined_call_operand.hbm [shape: f32[32,32], index: 3, kind: input, shape index: {}]   ;;  %s397_s4 = inlined_call_operand.vmem [shape: f32[1,32], index: 4, kind: input, shape index: {}]   ;;  %s398_s5 = inlined_call_operand.vmem [shape: f32[1,32], index: 5, kind: input, shape index: {}]   ;;  %s399_s6 = inlined_call_operand.<no memory space> [shape: f32[1,1], index: 6, kind: input, shape index: {}]   ;;  %s400_s7 = inlined_call_operand.vmem [shape: f32[20,1], index: 7, kind: output, shape index: {}]  }
   0x1   :  { %v12_v0 = vstv %s399_s6 }
   0x2   :  { %13 = vst [vmem:[#allocation2] sm:$0x1] %v12_v0 }
   0x3   :  { %14 = vsyncpa [#allocation4], 0 }
   0x4   :  { %15 = vsyncpa [#allocation6], 0  ;;  %s33_s28 = sshll.u32 %s394_s1, 4  ;;  %s313_s29 = smov [#allocation5]   ;;  %s34_s28 = int_to_ptr.hbm [resolvable:$true] %s33_s28 }
   0x5   :  { %s35_s30 = sshll.u32 %s313_s29, 4  ;;  %s20_s10 = sshll.u32 %s393_s0, 4  ;;  %s36_s30 = int_to_ptr.vmem [resolvable:$true] %s35_s30  ;;  %s21_s10 = int_to_ptr.hbm [resolvable:$true] %s20_s10 }
   0x6   :  { %s314_s11 = smov 128   ;;  %s315_s12 = smov 8  }
   0x7   :  { %41 = dma.hbm_to_vmem [thread:$0]  %s34_s28, 384, %s36_s30, [#allocation6], %s314_s11, %s314_s11, %s315_s12  }
   0x8   :  { %s316_s6 = smov [#allocation3]   ;;  %s48_s16 = sshll.u32 %s396_s3, 4  ;;  %s49_s16 = int_to_ptr.hbm [resolvable:$true] %s48_s16 }
   0x9   :  { %s22_s13 = sshll.u32 %s316_s6, 4  ;;  %s317_s1 = smov [#allocation7]   ;;  %s23_s13 = int_to_ptr.vmem [resolvable:$true] %s22_s13 }
   0xa   :  { %28 = dma.hbm_to_vmem [thread:$0]  %s21_s10, 384, %s23_s13, [#allocation4], %s314_s11, %s314_s11, %s315_s12  }
   0xb   :  { %s50_s17 = sshll.u32 %s317_s1, 4  ;;  %s51_s17 = int_to_ptr.vmem [resolvable:$true] %s50_s17 }
   0xc   :  { %56 = dma.hbm_to_vmem [thread:$0]  %s49_s16, 512, %s51_s17, [#allocation6], %s314_s11, %s314_s11, %s315_s12  }
   0xd   :  { %309 = dma.done.wait [#allocation4], 384  }
   0xe   :  { %310 = vsyncadd [#allocation4], 4294966912 }
   0xf   :  { %311 = dma.done.wait [#allocation6], 896  }
  0x10   :  { %312 = vsyncadd [#allocation6], 4294966400  ;;  %vm95_vm0 = vcmask 1045504   ;;  %v80_v1 = vld [vmem:[#allocation5 + $0x10] sm:$0x3f]  ;;  %v79_v2 = vld [vmem:[#allocation5 + $0x8] sm:$0xff] }
  0x11   :  { %210 = vmatpush.msk.msra.mxu0 %vm95_vm0, %v80_v1  ;;  %217 = vmatpush.msk.msra.mxu3 %vm95_vm0, %v80_v1  ;;  %v78_v3 = vld [vmem:[#allocation5] sm:$0xff]  ;;  %v75_v4 = vld [vmem:[#allocation3] sm:$0xff]  ;;  %vm85_vm1 = vcmask 179200   ;;  %v76_v5 = vld [vmem:[#allocation3 + $0x8] sm:$0xff]  ;;  %vm136_vm2 = vcmask 261120   ;;  %vm188_vm3 = vcmask 257024  }
  0x12   :  { %v131_v6 = vld [vmem:[#allocation7 + $0x18] sm:$0xff]  ;;  %v77_v7 = vld [vmem:[#allocation3 + $0x10] sm:$0xf]  ;;  %v130_v8 = vld [vmem:[#allocation7 + $0x10] sm:$0xff]  ;;  %vm199_vm4 = vcmask 7168   ;;  %vm202_vm5 = vcmask 3072  }
  0x13   :  { %113 = vmatpush.msra.mxu0 %v79_v2  ;;  %218 = vmatpush.msra.mxu3 %v79_v2  ;;  %v129_v9 = vld [vmem:[#allocation7 + $0x8] sm:$0xff]  ;;  %v128_v10 = vld [vmem:[#allocation7] sm:$0xff] }
  0x14   :  { %220 = vmatpush.msra.mxu1 %v131_v6  ;;  %221 = vmatpush.msra.mxu2 %v131_v6  ;;  %v233_v11 = vld [vmem:[%s395_s2] ss:$0 sm:$0xff] }
  0x15   :  { %114 = vmatpush.msra.mxu0 %v78_v3  ;;  %219 = vmatpush.msra.mxu3 %v78_v3  ;;  %v234_v21 = vld [vmem:[%s397_s4] ss:$0 sm:$0xff] }
  0x16   :  { %211 = vmatmul.msk.f32.vlgmr.msra.gmra.mxu0 %vm85_vm1, %v75_v4  ;;  %212 = vmatmul.msk.f32.vlgmr.msra.gmra.mxu3 %vm85_vm1, %v76_v5  ;;  %v235_v24 = vld [vmem:[%s398_s5] ss:$0 sm:$0xff] }
  0x17   :  { %158 = vmatpush.msrb.mxu0 %v131_v6  ;;  %222 = vmatpush.msra.mxu1 %v130_v8  ;;  %v236_v38 = vld [vmem:[#allocation2] ss:$0 sm:$0xff] }
  0x18   :  { %223 = vmatpush.msra.mxu2 %v130_v8 }
  0x19   :  { %159 = vmatpush.msrb.mxu0 %v130_v8  ;;  %224 = vmatpush.msra.mxu1 %v129_v9 }
  0x1a   :  { %225 = vmatpush.msra.mxu2 %v129_v9 }
  0x1b   :  { %160 = vmatpush.msrb.mxu0 %v129_v9  ;;  %226 = vmatpush.msra.mxu1 %v128_v10 }
  0x1c   :  { %227 = vmatpush.msra.mxu2 %v128_v10 }
  0x1d   :  { %161 = vmatpush.msrb.mxu0 %v128_v10 }
  0x1e   :  { %213 = vmatmul.msk.f32.gmra.mxu3 %vm85_vm1, %v77_v7 }
  0x93   :  { %v116_v12 = vpop.f32.mrf.mxu0 }
  0x94   :  { %v117_v13 = vadd.f32 %v233_v11, %v116_v12 }
  0x96   :  { %v125_v14 = vmax.f32 %v117_v13, 0.0 }
  0x98   :  { %214 = vmatmul.msk.f32.vlgmr.msrb.gmra.mxu0 %vm136_vm2, %v125_v14 }
  0x99   :  { %v119_v15 = vpop.f32.mrf.mxu3 }
  0x9a   :  { %v120_v16 = vadd.f32 %v233_v11, %v119_v15 }
  0x9c   :  { %v126_v17 = vmax.f32 %v120_v16, 0.0 }
  0x9e   :  { %215 = vmatmul.msk.f32.vlgmr.msra.gmra.mxu1 %vm136_vm2, %v126_v17 }
  0xa1   :  { %v122_v18 = vpop.f32.mrf.mxu3 }
  0xa2   :  { %v123_v19 = vadd.f32 %v233_v11, %v122_v18 }
  0xa4   :  { %v127_v20 = vmax.f32 %v123_v19, 0.0 }
  0xa6   :  { %216 = vmatmul.msk.f32.vlgmr.msra.gmra.mxu2 %vm136_vm2, %v127_v20 }
 0x115   :  { %v163_v22 = vpop.f32.mrf.mxu0 }
 0x116   :  { %v164_v23 = vadd.f32 %v234_v21, %v163_v22 }
 0x118   :  { %v172_v25 = vmax.f32 %v164_v23, 0.0 }
 0x11a   :  { %v179_v26 = vmul.f32 %v235_v24, %v172_v25 }
 0x11b   :  { %v166_v27 = vpop.f32.mrf.mxu1 }
 0x11c   :  { %v167_v28 = vadd.f32 %v234_v21, %v166_v27  ;;  %v182_v29 = vsel %vm136_vm2, %v179_v26, 0.0 }
 0x11d   :  { %183 = vadd.xlane.f32.xlu0 %v182_v29 }
 0x11e   :  { %v173_v30 = vmax.f32 %v167_v28, 0.0 }
 0x120   :  { %v180_v31 = vmul.f32 %v235_v24, %v173_v30 }
 0x122   :  { %v185_v32 = vsel %vm136_vm2, %v180_v31, 0.0 }
 0x125   :  { %186 = vadd.xlane.f32.xlu0 %v185_v32 }
 0x129   :  { %v169_v33 = vpop.f32.mrf.mxu2 }
 0x12a   :  { %v170_v34 = vadd.f32 %v234_v21, %v169_v33 }
 0x12c   :  { %v174_v35 = vmax.f32 %v170_v34, 0.0 }
 0x12e   :  { %v181_v36 = vmul.f32 %v235_v24, %v174_v35 }
 0x130   :  { %v189_v37 = vsel %vm188_vm3, %v181_v36, 0.0 }
 0x131   :  { %190 = vadd.xlane.f32.xlu1 %v189_v37 }
 0x190   :  { %v184_v39 = vpop.xlane.xlu0 %183 }
 0x191   :  { %v196_v40 = vadd.f32 %v236_v38, %v184_v39 }
 0x193   :  { %200 = vst.msk [vmem:[%s400_s7] sm:$0xff] %vm199_vm4, %v196_v40 }
 0x198   :  { %v187_v41 = vpop.xlane.xlu0 %186 }
 0x199   :  { %v197_v42 = vadd.f32 %v236_v38, %v187_v41 }
 0x19b   :  { %201 = vst.msk [vmem:[%s400_s7 + $0x8] sm:$0xff] %vm199_vm4, %v197_v42 }
 0x1a4   :  { %v191_v43 = vpop.xlane.xlu1 %190 }
 0x1a5   :  { %v198_v44 = vadd.f32 %v236_v38, %v191_v43 }
 0x1a7   :  { %203 = vst.msk [vmem:[%s400_s7 + $0x10] sm:$0xf] %vm202_vm5, %v198_v44 }
 0x1a8   :  { %208 = vsyncpa [#allocation4], 1 }
 0x1a9   :  { %209 = vsyncpa [#allocation6], 1 }

</bundles_post_ra>
